<compile_context>
chip_gen: v7x
topology: tpu7x:2x2x1
jax: 0.10.0
libtpu: 0.0.40
codegen_flags: <defaults>
</compile_context>

<pallas_src>
import jax
import jax.numpy as jnp
from jax.experimental import pallas as pl
from jax.experimental.pallas import tpu as pltpu

LANE = 128  # TPU lane width; output is zero-padded to this for lane-dense stores


def mlp_kernel(x_ref,
               w0_ref, b0_ref,
               w1_ref, b1_ref,
               w2_ref, b2_ref,
               w3_ref, b3_ref,
               o_ref):
    # All matmuls: bf16 inputs, f32 accumulation (MXU fast path).
    # Layer 0: Linear + ReLU
    h = jnp.dot(x_ref[...], w0_ref[...], preferred_element_type=jnp.float32)
    h = jnp.maximum(h + b0_ref[...], 0.0).astype(jnp.bfloat16)

    # Layer 1: Linear + ReLU (+ Dropout -> identity in eval)
    h = jnp.dot(h, w1_ref[...], preferred_element_type=jnp.float32)
    h = jnp.maximum(h + b1_ref[...], 0.0).astype(jnp.bfloat16)

    # Layer 2: Linear + ReLU (+ Dropout -> identity in eval)
    h = jnp.dot(h, w2_ref[...], preferred_element_type=jnp.float32)
    h = jnp.maximum(h + b2_ref[...], 0.0).astype(jnp.bfloat16)

    # Output layer: Linear (no activation), lane-dense (128-wide, zero-padded) store.
    out = jnp.dot(h, w3_ref[...], preferred_element_type=jnp.float32) + b3_ref[...]
    o_ref[...] = out.astype(o_ref.dtype)


def simple_nn_forward(x, params, *, tb=256):
    """Fused MLP forward. Batch is tiled over a 1-D parallel grid; weights stay
    resident in VMEM across grid steps (DMA'd once)."""
    (w0, b0), (w1, b1), (w2, b2), (w3, b3) = params
    batch, in_dim = x.shape
    h0, h1, h2 = w0.shape[1], w1.shape[1], w2.shape[1]
    out_dim = w3.shape[1]

    # Zero-pad the final layer to 128 output lanes -> unmasked vector stores.
    w3p = jnp.zeros((w3.shape[0], LANE), w3.dtype).at[:, :out_dim].set(w3)
    b3p = jnp.zeros((1, LANE), b3.dtype).at[:, :out_dim].set(b3)

    # Batch tile: multiple of 8 sublanes, clamped to the (padded) batch.
    tb_eff = min(tb, ((batch + 7) // 8) * 8)
    pb = ((batch + tb_eff - 1) // tb_eff) * tb_eff
    if pb != batch:
        x = jnp.pad(x, ((0, pb - batch), (0, 0)))
    grid = (pb // tb_eff,)

    # bf16 activations/weights (MXU bf16-in/f32-acc fast path, halves DMA bytes);
    # biases and accumulation stay f32. Casts are done in the wrapper (cheap XLA ops).
    xb = x.astype(jnp.bfloat16)
    w0b = w0.astype(jnp.bfloat16)
    w1b = w1.astype(jnp.bfloat16)
    w2b = w2.astype(jnp.bfloat16)
    w3b = w3p.astype(jnp.bfloat16)

    def resident(shape):
        # Same block every grid step -> weights/biases stay resident in VMEM.
        return pl.BlockSpec(shape, lambda i: (0, 0))

    weight_elems = in_dim * h0 + h0 * h1 + h1 * h2 + h2 * LANE
    flops = 2 * pb * weight_elems
    bytes_accessed = (pb * in_dim * 2            # x (bf16)
                      + weight_elems * 2         # weights (bf16)
                      + (h0 + h1 + h2 + LANE) * 4  # biases (f32)
                      + pb * LANE * 4)           # output (f32)

    out = pl.pallas_call(
        mlp_kernel,
        out_shape=jax.ShapeDtypeStruct((pb, LANE), jnp.float32),
        grid=grid,
        in_specs=[
            pl.BlockSpec((tb_eff, in_dim), lambda i: (i, 0)),
            resident((in_dim, h0)), resident((1, h0)),
            resident((h0, h1)), resident((1, h1)),
            resident((h1, h2)), resident((1, h2)),
            resident((h2, LANE)), resident((1, LANE)),
        ],
        out_specs=pl.BlockSpec((tb_eff, LANE), lambda i: (i, 0)),
        compiler_params=pltpu.CompilerParams(
            dimension_semantics=("parallel",)),
        cost_estimate=pl.CostEstimate(
            flops=flops, bytes_accessed=bytes_accessed, transcendentals=0),
    )(xb, w0b, b0, w1b, b1, w2b, b2, w3b, b3p)

    return out[:batch, :out_dim]


def init_linear(key, fan_in, fan_out):
    """PyTorch-style nn.Linear init: U(-1/sqrt(fan_in), 1/sqrt(fan_in))."""
    kw, kb = jax.random.split(key)
    bound = 1.0 / (fan_in ** 0.5)
    w = jax.random.uniform(kw, (fan_in, fan_out), jnp.float32, -bound, bound)
    b = jax.random.uniform(kb, (1, fan_out), jnp.float32, -bound, bound)
    return w, b


def reference_forward_bf16(x, params):
    """Mirrors the kernel's numerics: bf16 operands, f32 accumulation."""
    h = x.astype(jnp.bfloat16)
    for i, (w, b) in enumerate(params):
        h = jnp.dot(h, w.astype(jnp.bfloat16),
                    preferred_element_type=jnp.float32) + b
        if i < len(params) - 1:
            h = jnp.maximum(h, 0.0).astype(jnp.bfloat16)
    return h


if __name__ == "__main__":
    input_size = 32
    hidden_layers = [128, 128, 128]
    output_size = 8
    batch = 16       # small demo batch
    tile_b = 8       # small tile so the demo exercises a multi-step (2) grid

    key = jax.random.PRNGKey(0)
    k_x, k0, k1, k2, k3 = jax.random.split(key, 5)

    params = [
        init_linear(k0, input_size, hidden_layers[0]),
        init_linear(k1, hidden_layers[0], hidden_layers[1]),
        init_linear(k2, hidden_layers[1], hidden_layers[2]),
        init_linear(k3, hidden_layers[2], output_size),
    ]

    x = jax.random.normal(k_x, (batch, input_size), jnp.float32)

    out = simple_nn_forward(x, params, tb=tile_b)
    out = jax.block_until_ready(out)

    ref = reference_forward_bf16(x, params)
    assert out.shape == (batch, output_size)
    assert jnp.allclose(out, ref, atol=1e-2, rtol=1e-2), "mismatch vs reference"

    print("KERNEL_OK")
</pallas_src>

<mosaic_0001>
module attributes {stable_mosaic.version = 11 : i64} {
  func.func @mlp_kernel(%arg0: i32, %arg1: memref<8x32xbf16, #tpu.memory_space<vmem>>, %arg2: memref<32x128xbf16, #tpu.memory_space<vmem>>, %arg3: memref<1x128xf32, #tpu.memory_space<vmem>>, %arg4: memref<128x128xbf16, #tpu.memory_space<vmem>>, %arg5: memref<1x128xf32, #tpu.memory_space<vmem>>, %arg6: memref<128x128xbf16, #tpu.memory_space<vmem>>, %arg7: memref<1x128xf32, #tpu.memory_space<vmem>>, %arg8: memref<128x128xbf16, #tpu.memory_space<vmem>>, %arg9: memref<1x128xf32, #tpu.memory_space<vmem>>, %arg10: memref<8x128xf32, #tpu.memory_space<vmem>>) attributes {dimension_semantics = [#tpu.dimension_semantics<parallel>], iteration_bounds = array<i64: 2>, scalar_prefetch = 0 : i64, scratch_operands = 0 : i64, tpu.core_type = #tpu.core_type<tc>, window_params = [{transform_indices = @transform_0, window_bounds = array<i64: 8, 32>}, {pipeline_mode = #tpu.pipeline_mode<synchronous>, transform_indices = @transform_1, window_bounds = array<i64: 32, 128>}, {pipeline_mode = #tpu.pipeline_mode<synchronous>, transform_indices = @transform_2, window_bounds = array<i64: 1, 128>}, {pipeline_mode = #tpu.pipeline_mode<synchronous>, transform_indices = @transform_3, window_bounds = array<i64: 128, 128>}, {pipeline_mode = #tpu.pipeline_mode<synchronous>, transform_indices = @transform_4, window_bounds = array<i64: 1, 128>}, {pipeline_mode = #tpu.pipeline_mode<synchronous>, transform_indices = @transform_5, window_bounds = array<i64: 128, 128>}, {pipeline_mode = #tpu.pipeline_mode<synchronous>, transform_indices = @transform_6, window_bounds = array<i64: 1, 128>}, {pipeline_mode = #tpu.pipeline_mode<synchronous>, transform_indices = @transform_7, window_bounds = array<i64: 128, 128>}, {pipeline_mode = #tpu.pipeline_mode<synchronous>, transform_indices = @transform_8, window_bounds = array<i64: 1, 128>}, {transform_indices = @transform_9, window_bounds = array<i64: 8, 128>}]} {
    %c0 = arith.constant 0 : index
    %c0_0 = arith.constant 0 : index
    %0 = vector.load %arg1[%c0, %c0_0] : memref<8x32xbf16, #tpu.memory_space<vmem>>, vector<8x32xbf16>
    %c0_1 = arith.constant 0 : index
    %c0_2 = arith.constant 0 : index
    %1 = vector.load %arg2[%c0_1, %c0_2] : memref<32x128xbf16, #tpu.memory_space<vmem>>, vector<32x128xbf16>
    %cst = arith.constant dense<0.000000e+00> : vector<8x128xf32>
    %2 = tpu.matmul %0, %1, %cst {dimension_numbers = #tpu.dot_dimension_numbers<[1], [0], [0], [1], [0, 0, 1, 1], [], []>} : vector<8x32xbf16>, vector<32x128xbf16>, vector<8x128xf32> -> vector<8x128xf32>
    %c0_3 = arith.constant 0 : index
    %c0_4 = arith.constant 0 : index
    %3 = vector.load %arg3[%c0_3, %c0_4] : memref<1x128xf32, #tpu.memory_space<vmem>>, vector<1x128xf32>
    %4 = vector.broadcast %3 : vector<1x128xf32> to vector<8x128xf32>
    %5 = arith.addf %2, %4 : vector<8x128xf32>
    %cst_5 = arith.constant 0.000000e+00 : f32
    %6 = vector.broadcast %cst_5 : f32 to vector<8x128xf32>
    %7 = arith.maximumf %5, %6 : vector<8x128xf32>
    %8 = arith.truncf %7 : vector<8x128xf32> to vector<8x128xbf16>
    %c0_6 = arith.constant 0 : index
    %c0_7 = arith.constant 0 : index
    %9 = vector.load %arg4[%c0_6, %c0_7] : memref<128x128xbf16, #tpu.memory_space<vmem>>, vector<128x128xbf16>
    %cst_8 = arith.constant dense<0.000000e+00> : vector<8x128xf32>
    %10 = tpu.matmul %8, %9, %cst_8 {dimension_numbers = #tpu.dot_dimension_numbers<[1], [0], [0], [1], [0, 0, 1, 1], [], []>} : vector<8x128xbf16>, vector<128x128xbf16>, vector<8x128xf32> -> vector<8x128xf32>
    %c0_9 = arith.constant 0 : index
    %c0_10 = arith.constant 0 : index
    %11 = vector.load %arg5[%c0_9, %c0_10] : memref<1x128xf32, #tpu.memory_space<vmem>>, vector<1x128xf32>
    %12 = vector.broadcast %11 : vector<1x128xf32> to vector<8x128xf32>
    %13 = arith.addf %10, %12 : vector<8x128xf32>
    %cst_11 = arith.constant 0.000000e+00 : f32
    %14 = vector.broadcast %cst_11 : f32 to vector<8x128xf32>
    %15 = arith.maximumf %13, %14 : vector<8x128xf32>
    %16 = arith.truncf %15 : vector<8x128xf32> to vector<8x128xbf16>
    %c0_12 = arith.constant 0 : index
    %c0_13 = arith.constant 0 : index
    %17 = vector.load %arg6[%c0_12, %c0_13] : memref<128x128xbf16, #tpu.memory_space<vmem>>, vector<128x128xbf16>
    %cst_14 = arith.constant dense<0.000000e+00> : vector<8x128xf32>
    %18 = tpu.matmul %16, %17, %cst_14 {dimension_numbers = #tpu.dot_dimension_numbers<[1], [0], [0], [1], [0, 0, 1, 1], [], []>} : vector<8x128xbf16>, vector<128x128xbf16>, vector<8x128xf32> -> vector<8x128xf32>
    %c0_15 = arith.constant 0 : index
    %c0_16 = arith.constant 0 : index
    %19 = vector.load %arg7[%c0_15, %c0_16] : memref<1x128xf32, #tpu.memory_space<vmem>>, vector<1x128xf32>
    %20 = vector.broadcast %19 : vector<1x128xf32> to vector<8x128xf32>
    %21 = arith.addf %18, %20 : vector<8x128xf32>
    %cst_17 = arith.constant 0.000000e+00 : f32
    %22 = vector.broadcast %cst_17 : f32 to vector<8x128xf32>
    %23 = arith.maximumf %21, %22 : vector<8x128xf32>
    %24 = arith.truncf %23 : vector<8x128xf32> to vector<8x128xbf16>
    %c0_18 = arith.constant 0 : index
    %c0_19 = arith.constant 0 : index
    %25 = vector.load %arg8[%c0_18, %c0_19] : memref<128x128xbf16, #tpu.memory_space<vmem>>, vector<128x128xbf16>
    %cst_20 = arith.constant dense<0.000000e+00> : vector<8x128xf32>
    %26 = tpu.matmul %24, %25, %cst_20 {dimension_numbers = #tpu.dot_dimension_numbers<[1], [0], [0], [1], [0, 0, 1, 1], [], []>} : vector<8x128xbf16>, vector<128x128xbf16>, vector<8x128xf32> -> vector<8x128xf32>
    %c0_21 = arith.constant 0 : index
    %c0_22 = arith.constant 0 : index
    %27 = vector.load %arg9[%c0_21, %c0_22] : memref<1x128xf32, #tpu.memory_space<vmem>>, vector<1x128xf32>
    %28 = vector.broadcast %27 : vector<1x128xf32> to vector<8x128xf32>
    %29 = arith.addf %26, %28 : vector<8x128xf32>
    %c0_23 = arith.constant 0 : index
    %c0_24 = arith.constant 0 : index
    %30 = vector.load %arg10[%c0_23, %c0_24] : memref<8x128xf32, #tpu.memory_space<vmem>>, vector<8x128xf32>
    tpu.vector_store %arg10[%c0_23, %c0_24], %29 {strides = array<i32>} : memref<8x128xf32, #tpu.memory_space<vmem>>, vector<8x128xf32>,
    return
  }
  func.func @transform_0(%arg0: i32) -> (i32, i32) {
    %c0_i32 = arith.constant 0 : i32
    %c0_i32_0 = arith.constant 0 : i32
    return %arg0, %c0_i32 : i32, i32
  }
  func.func @transform_1(%arg0: i32) -> (i32, i32) {
    %c0_i32 = arith.constant 0 : i32
    %c0_i32_0 = arith.constant 0 : i32
    %c0_i32_1 = arith.constant 0 : i32
    return %c0_i32, %c0_i32_0 : i32, i32
  }
  func.func @transform_2(%arg0: i32) -> (i32, i32) {
    %c0_i32 = arith.constant 0 : i32
    %c0_i32_0 = arith.constant 0 : i32
    %c0_i32_1 = arith.constant 0 : i32
    return %c0_i32, %c0_i32_0 : i32, i32
  }
  func.func @transform_3(%arg0: i32) -> (i32, i32) {
    %c0_i32 = arith.constant 0 : i32
    %c0_i32_0 = arith.constant 0 : i32
    %c0_i32_1 = arith.constant 0 : i32
    return %c0_i32, %c0_i32_0 : i32, i32
  }
  func.func @transform_4(%arg0: i32) -> (i32, i32) {
    %c0_i32 = arith.constant 0 : i32
    %c0_i32_0 = arith.constant 0 : i32
    %c0_i32_1 = arith.constant 0 : i32
    return %c0_i32, %c0_i32_0 : i32, i32
  }
  func.func @transform_5(%arg0: i32) -> (i32, i32) {
    %c0_i32 = arith.constant 0 : i32
    %c0_i32_0 = arith.constant 0 : i32
    %c0_i32_1 = arith.constant 0 : i32
    return %c0_i32, %c0_i32_0 : i32, i32
  }
  func.func @transform_6(%arg0: i32) -> (i32, i32) {
    %c0_i32 = arith.constant 0 : i32
    %c0_i32_0 = arith.constant 0 : i32
    %c0_i32_1 = arith.constant 0 : i32
    return %c0_i32, %c0_i32_0 : i32, i32
  }
  func.func @transform_7(%arg0: i32) -> (i32, i32) {
    %c0_i32 = arith.constant 0 : i32
    %c0_i32_0 = arith.constant 0 : i32
    %c0_i32_1 = arith.constant 0 : i32
    return %c0_i32, %c0_i32_0 : i32, i32
  }
  func.func @transform_8(%arg0: i32) -> (i32, i32) {
    %c0_i32 = arith.constant 0 : i32
    %c0_i32_0 = arith.constant 0 : i32
    %c0_i32_1 = arith.constant 0 : i32
    return %c0_i32, %c0_i32_0 : i32, i32
  }
  func.func @transform_9(%arg0: i32) -> (i32, i32) {
    %c0_i32 = arith.constant 0 : i32
    %c0_i32_0 = arith.constant 0 : i32
    return %arg0, %c0_i32 : i32, i32
  }
}

</mosaic_0001>

<bundles_post_ra>
// kernel: tpu_custom_call.1
= control target key start
LH: loop header
LB: loop body
LE: loop exit
PB: predicated region body
PF: predicated region fallthrough
CT: control target
= control target key end

     0   :  { %s1820_s0 = inlined_call_operand.hbm [shape: bf16[16,32], index: 0, kind: input, shape index: {}]   ;;  %s1821_s1 = inlined_call_operand.hbm [shape: bf16[32,128], index: 1, kind: input, shape index: {}]   ;;  %s1822_s2 = inlined_call_operand.vmem [shape: f32[1,128], index: 2, kind: input, shape index: {}]   ;;  %s1823_s3 = inlined_call_operand.hbm [shape: bf16[128,128], index: 3, kind: input, shape index: {}]   ;;  %s1824_s4 = inlined_call_operand.vmem [shape: f32[1,128], index: 4, kind: input, shape index: {}]   ;;  %s1825_s5 = inlined_call_operand.hbm [shape: bf16[128,128], index: 5, kind: input, shape index: {}]   ;;  %s1826_s6 = inlined_call_operand.vmem [shape: f32[1,128], index: 6, kind: input, shape index: {}]   ;;  %s1827_s7 = inlined_call_operand.hbm [shape: bf16[128,128], index: 7, kind: input, shape index: {}]   ;;  %s1828_s8 = inlined_call_operand.vmem [shape: f32[1,128], index: 8, kind: input, shape index: {}]   ;;  %s1829_s9 = inlined_call_operand.hbm [shape: f32[16,128], index: 9, kind: output, shape index: {}]  }
   0x1   :  { %1834 = sst [smem:[#allocation16_spill]] %s1821_s1 }
   0x2   :  { %1835 = sst [smem:[#allocation17_spill]] %s1829_s9 }
   0x3   :  { %14 = vsyncpa [#allocation3], 0 }
   0x4   :  { %16 = vsyncpa [#allocation3 + $0x1], 0 }
   0x5   :  { %17 = vsyncpa [#allocation6], 0 }
   0x6   :  { %18 = vsyncpa [#allocation9], 0 }
   0x7   :  { %19 = vsyncpa [#allocation4], 0 }
   0x8   :  { %21 = vsyncpa [#allocation4 + $0x1], 0  ;;  %s1481_s30 = smov 0   ;;  %s1483_s10 = smov 0  }
   0x9   :  { %s1485_s11 = smov 0   ;;  %s1487_s12 = smov 0  }
   0xa LB: > { %s1421_s13 = smov [#allocation5]   ;;  %s1502_s15 = sadd.s32 4294967295, %s1419_s12   ;;  %s1419_s12 = sphi %s1487_s12, %s1858_s12   ;;  %s1415_s11 = sphi %s1485_s11, %s1857_s11   ;;  %s1411_s10 = sphi %s1483_s10, %s1856_s10   ;;  %s1407_s30 = sphi %s1481_s30, %s1855_s30  }
   0xb   : > { %s264_s14 = sshll.u32 %s1421_s13, 4  ;;  %p938_p0 = scmp.ge.s32.totalorder %s1419_s12, 1  ;;  %s1507_s14 = int_to_ptr.vmem [resolvable:$true] %s264_s14 }
   0xc   : > { %p1831_p1 = scmp.eq.s32.totalorder %s1502_s15, 0  ;;  %p252_p2 = scmp.lt.s32.totalorder %s1419_s12, 3 }
   0xd   : > { %s1422_s17 = smov [#allocation8]   ;;  %s1423_s20 = smov [#allocation7]  }
   0xe   : > { %p1509_p3 = pnand %p938_p0, %p252_p2  ;;  %s296_s18 = sshll.u32 %s1422_s17, 4  ;;  %s1522_s18 = int_to_ptr.vmem [resolvable:$true] %s296_s18 }
   0xf   : > { %s280_s21 = sshll.u32 %s1423_s20, 4  ;;  %s1838_s1 = sld [smem:[#allocation16_spill]]  ;;  %s1524_s21 = int_to_ptr.vmem [resolvable:$true] %s280_s21 }
  0x10   : > { %s1836_s16 = scalar_select %p1509_p3, 1, 0 }
  0x11   : > { %p1106_p5 = pneg %p1509_p3 }
  0x13   : > { %p1518_p6 = pnand %p1106_p5, %p1831_p1 }
  0x15   : > { %s1203_s24 = scalar_lea.hbm %s1838_s1, 256  ;;  %p1534_p8 = pneg %p1518_p6 }
  0x16   : > { %p1204_p7 = scmp.ne.s32.totalorder %s1838_s1, %s1203_s24  ;;  %p1210_p11 = scmp.lt.u32.totalorder %s1203_s24, %s1838_s1 }
  0x18   : > { %p1206_p9 = pnand %p1534_p8, %p1204_p7 }
  0x1a   : > { %p1207_p10 = pneg %p1206_p9 }
  0x1c   : > { %p1212_p12 = pnand %p1210_p11, %p1207_p10 }
  0x1e   : > { %1215 = shalt.err (!%p1212_p12)
}
  0x1f   : > { %s1216_s13 = scalar_lea.vmem %s1507_s14, 256  ;;  %p1224_p5 = scmp.lt.s32.totalorder %s1507_s14, %s1507_s14 }
  0x20   : > { %p1217_p13 = scmp.ne.s32.totalorder %s1507_s14, %s1216_s13  ;;  %p1225_p4 = scmp.lt.s32.totalorder %s1216_s13, %s1216_s13 }
  0x22   : > { %p1219_p0 = pnand %p1217_p13, %p1534_p8  ;;  %p1226_p7 = por %p1225_p4, %p1224_p5 }
  0x24   : > { %p1220_p2 = pneg %p1219_p0 }
  0x26   : > { %p1227_p9 = pnand %p1226_p7, %p1220_p2 }
  0x28   : > { %1230 = shalt.err (!%p1227_p9)
}
  0x29   : > { %s1424_s17 = smov 64   ;;  %s1425_s20 = smov 4  }
  0x2a   : > { %1109 = dma.hbm_to_vmem [thread:$0]  (!%p1518_p6), %s1838_s1, 256, %s1507_s14, [#allocation6], %s1424_s17, %s1424_s17, %s1425_s20  }
  0x2b   : > { %s1231_s26 = scalar_lea.hbm %s1825_s5, 1024 }
  0x2c   : > { %p1232_p4 = scmp.ne.s32.totalorder %s1825_s5, %s1231_s26  ;;  %p1238_p12 = scmp.lt.u32.totalorder %s1231_s26, %s1825_s5 }
  0x2e   : > { %p1234_p10 = pnand %p1232_p4, %p1534_p8 }
  0x30   : > { %p1235_p11 = pneg %p1234_p10 }
  0x32   : > { %p1240_p13 = pnand %p1238_p12, %p1235_p11 }
  0x34   : > { %1243 = shalt.err (!%p1240_p13)
}
  0x35   : > { %s1244_s14 = scalar_lea.vmem %s1522_s18, 1024  ;;  %p1252_p7 = scmp.lt.s32.totalorder %s1522_s18, %s1522_s18 }
  0x36   : > { %p1245_p0 = scmp.ne.s32.totalorder %s1522_s18, %s1244_s14  ;;  %p1253_p9 = scmp.lt.s32.totalorder %s1244_s14, %s1244_s14 }
  0x38   : > { %p1247_p2 = pnand %p1245_p0, %p1534_p8  ;;  %p1254_p4 = por %p1253_p9, %p1252_p7 }
  0x3a   : > { %p1248_p5 = pneg %p1247_p2 }
  0x3c   : > { %p1255_p10 = pnand %p1254_p4, %p1248_p5 }
  0x3e   : > { %1258 = shalt.err (!%p1255_p10)
}
  0x3f   : > { %1115 = dma.hbm_to_vmem [thread:$0]  (!%p1518_p6), %s1825_s5, 1024, %s1522_s18, [#allocation9], %s1424_s17, %s1424_s17, %s1425_s20  }
  0x40   : > { %s1259_s25 = scalar_lea.hbm %s1823_s3, 1024 }
  0x41   : > { %p1260_p11 = scmp.ne.s32.totalorder %s1823_s3, %s1259_s25  ;;  %p1266_p0 = scmp.lt.u32.totalorder %s1259_s25, %s1823_s3 }
  0x43   : > { %p1262_p12 = pnand %p1260_p11, %p1534_p8 }
  0x45   : > { %p1263_p13 = pneg %p1262_p12 }
  0x47   : > { %p1268_p2 = pnand %p1266_p0, %p1263_p13 }
  0x49   : > { %1271 = shalt.err (!%p1268_p2)
}
  0x4a   : > { %s1272_s18 = scalar_lea.vmem %s1524_s21, 1024  ;;  %p1280_p4 = scmp.lt.s32.totalorder %s1524_s21, %s1524_s21 }
  0x4b   : > { %p1273_p5 = scmp.ne.s32.totalorder %s1524_s21, %s1272_s18  ;;  %p1281_p10 = scmp.lt.s32.totalorder %s1272_s18, %s1272_s18 }
  0x4d   : > { %p1275_p7 = pnand %p1273_p5, %p1534_p8  ;;  %p1282_p11 = por %p1281_p10, %p1280_p4 }
  0x4f   : > { %p1276_p9 = pneg %p1275_p7 }
  0x51   : > { %p1283_p12 = pnand %p1282_p11, %p1276_p9 }
  0x53   : > { %1286 = shalt.err (!%p1283_p12)
}
  0x54   : > { %1112 = dma.hbm_to_vmem [thread:$0]  (!%p1518_p6), %s1823_s3, 1024, %s1524_s21, [#allocation6], %s1424_s17, %s1424_s17, %s1425_s20  }
  0x55   : > { %s1426_s22 = smov [#allocation10]   ;;  %s1287_s26 = scalar_lea.hbm %s1827_s7, 1024 }
  0x56   : > { %s312_s23 = sshll.u32 %s1426_s22, 4  ;;  %p1288_p13 = scmp.ne.s32.totalorder %s1827_s7, %s1287_s26  ;;  %s313_s23 = int_to_ptr.vmem [resolvable:$true] %s312_s23 }
  0x57   : > { %p1294_p5 = scmp.lt.u32.totalorder %s1287_s26, %s1827_s7 }
  0x58   : > { %p1290_p0 = pnand %p1288_p13, %p1534_p8 }
  0x5a   : > { %p1291_p2 = pneg %p1290_p0 }
  0x5c   : > { %p1296_p7 = pnand %p1294_p5, %p1291_p2 }
  0x5e   : > { %1299 = shalt.err (!%p1296_p7)
}
  0x5f   : > { %s1300_s21 = scalar_lea.vmem %s313_s23, 1024  ;;  %p1308_p11 = scmp.lt.s32.totalorder %s313_s23, %s313_s23 }
  0x60   : > { %p1301_p9 = scmp.ne.s32.totalorder %s313_s23, %s1300_s21  ;;  %p1309_p12 = scmp.lt.s32.totalorder %s1300_s21, %s1300_s21 }
  0x62   : > { %p1303_p4 = pnand %p1301_p9, %p1534_p8  ;;  %p1310_p1 = por %p1309_p12, %p1308_p11 }
  0x64   : > { %p1304_p10 = pneg %p1303_p4 }
  0x66   : > { %p1311_p3 = pnand %p1310_p1, %p1304_p10 }
  0x68   : > { %1314 = shalt.err (!%p1311_p3)
}
  0x69   : > { %1118 = dma.hbm_to_vmem [thread:$0]  (!%p1518_p6), %s1827_s7, 1024, %s313_s23, [#allocation9], %s1424_s17, %s1424_s17, %s1425_s20  }
  0x6a   : > { %s937_s19 = sadd.s32 4294967294, %s1419_s12   ;;  %s1633_s27 = sadd.s32 1, %s1419_s12  }
  0x6b   : > { %s31_s22 = ssub.s32 %s1419_s12, %s1633_s27  ;;  %s34_s24 = sadd.s32 1, %s1415_s11 }
  0x6c   : > { %p32_p1 = scmp.eq.s32.totalorder %s31_s22, 0  ;;  %p41_p3 = scmp.ne.s32.totalorder %s1415_s11, %s1411_s10 }
  0x6d   : > { %p42_p8 = scmp.eq.s32.totalorder %s1419_s12, 0  ;;  %p47_p13 = scmp.ne.s32.totalorder %s1411_s10, %s1407_s30 }
  0x6e   : > { %s1644_s25 = scalar_select %p32_p1, %s1415_s11, %s34_s24  }
  0x6f   : > { %p1646_p0 = por %p42_p8, %p41_p3  ;;  %p1841_p2 = scmp.eq.s32.totalorder %s1502_s15, 0 }
  0x70   : > { %p239_p5 = scmp.eq.s32.totalorder %s1502_s15, 1  ;;  %p245_p7 = scmp.eq.s32.totalorder %s937_s19, 1 }
  0x71   : > { %p1652_p6 = por %p1841_p2, %p47_p13  ;;  %p1131_p9 = scmp.lt.s32.totalorder %s1419_s12, 2 }
  0x72   : > { %s329_s20 = sand.u32 1, %s1415_s11   ;;  %p1659_p4 = por %p239_p5, %p41_p3 }
  0x73   : > { %p1663_p10 = por %p245_p7, %p47_p13  ;;  %s944_s29 = sshll.u32 %s329_s20, 2 }
  0x74   : > { %s1843_s23 = scalar_select %p1659_p4, 1, 0 }
  0x75   : > { %s1844_s28 = scalar_select %p1663_p10, 1, 0 }
  0x76   : > { %s945_s13 = sshll.u32 %s1419_s12, 6  ;;  %s333_s9 = scalar_lea.vmem [#allocation2], %s944_s29 }
  0x77   : > { %s1671_s14 = scalar_lea.hbm %s1820_s0, %s945_s13  ;;  %s340_s19 = sshll.u32 %s333_s9, 4  ;;  %s1673_s19 = int_to_ptr.vmem [resolvable:$true] %s340_s19 }
  0x78   : > { %p1677_p11 = pnand %p1131_p9, %p1646_p0  ;;  %s330_s24 = scalar_lea.sflag [#allocation3], %s329_s20 }
  0x79   : > { %s1315_s1 = scalar_lea.hbm %s1671_s14, 64  ;;  %s1320_s18 = scalar_lea.hbm %s1820_s0, 128 }
  0x7a   : > { %p1316_p12 = scmp.ne.s32.totalorder %s1671_s14, %s1315_s1  ;;  %p1317_p1 = pneg %p1677_p11 }
  0x7b   : > { %p1321_p13 = scmp.lt.u32.totalorder %s1671_s14, %s1820_s0  ;;  %p1322_p0 = scmp.lt.u32.totalorder %s1320_s18, %s1315_s1 }
  0x7c   : > { %p1318_p3 = pnand %p1317_p1, %p1316_p12  ;;  %p1324_p5 = scmp.lt.u32.totalorder %s1315_s1, %s1671_s14 }
  0x7d   : > { %p1323_p2 = por %p1322_p0, %p1321_p13 }
  0x7e   : > { %p1319_p8 = pneg %p1318_p3 }
  0x7f   : > { %p1325_p7 = por %p1324_p5, %p1323_p2 }
  0x81   : > { %p1326_p9 = pnand %p1325_p7, %p1319_p8 }
  0x83   : > { %1329 = shalt.err (!%p1326_p9)
}
  0x84   : > { %s1330_s20 = scalar_lea.vmem %s1673_s19, 64  ;;  %s1427_s9 = smov [#allocation2]  }
  0x85   : > { %p1331_p12 = scmp.ne.s32.totalorder %s1673_s19, %s1330_s20  ;;  %s1335_s29 = sshll.u32 %s1427_s9, 4  ;;  %s1336_s29 = int_to_ptr.vmem [resolvable:$false] %s1335_s29 }
  0x86   : > { %s1337_s13 = scalar_lea.vmem %s1336_s29, 128  ;;  %p1338_p4 = scmp.lt.s32.totalorder %s1673_s19, %s1336_s29 }
  0x87   : > { %p1333_p3 = pnand %p1331_p12, %p1317_p1  ;;  %p1339_p13 = scmp.lt.s32.totalorder %s1337_s13, %s1330_s20 }
  0x89   : > { %p1334_p10 = pneg %p1333_p3  ;;  %p1340_p0 = por %p1339_p13, %p1338_p4 }
  0x8b   : > { %p1341_p2 = pnand %p1340_p0, %p1334_p10 }
  0x8d   : > { %1344 = shalt.err (!%p1341_p2)
}
  0x8e   : > { %1122 = dma.hbm_to_vmem [thread:$0]  (!%p1677_p11), %s1671_s14, 64, %s1673_s19, %s330_s24  }
  0x8f   : > { %p1846_p8 = scmp.ne.s32.totalorder %s1836_s16, 0 }
  0x90   : > { %s1709_s1 = sand.u32 (!%p1846_p8), 1, %s1411_s10  }
  0x91   : > { %349 = sbr.rel (%p1846_p8) target bundleno = 1051 (0x41b), region = 56  ;;  %s947_s18 = sshll.u32 (!%p1846_p8), %s1709_s1, 2 }
  0x92   : > { %s352_s26 = scalar_lea.sflag (!%p1846_p8), [#allocation3], %s1709_s1  ;;  %s355_s21 = scalar_lea.vmem (!%p1846_p8), [#allocation2], %s947_s18 }
  0x98   : > { %1390 = dma.done.wait (%p1652_p6), %s352_s26, 64  }
  0x99   : > { %1392 = vsyncadd (%p1652_p6), %s352_s26, 4294967232  ;;  %p1847_p4 = scmp.eq.s32.totalorder %s1502_s15, 0 }
  0x9b   : > { %1394 = dma.done.wait (%p1847_p4), [#allocation6], 1280   ;;  %p1848_p10 = pmov %p1847_p4 }
  0x9c   : > { %p1849_p11 = pmov %p1847_p4 }
  0x9d   : > { %1396 = vsyncadd (%p1848_p10), [#allocation6], 4294966016 }
  0x9e   : > { %1398 = dma.done.wait (%p1849_p11), [#allocation9], 2048   ;;  %p1850_p1 = pmov %p1847_p4 }
  0x9f   : > { %v1428_v0 = vmov 0.0   ;;  %vm1429_vm0 = vmmov 0   ;;  %v1177_v1 = vld [vmem:[#allocation5] sm:$0xff]   ;;  %v1178_v2 = vld [vmem:[#allocation5 + $0x8] sm:$0xff]   ;;  %v1179_v3 = vld [vmem:[#allocation7] sm:$0xff]   ;;  %vm431_vm1 = vcmask 261120  }
  0xa0   : > { %1400 = vsyncadd (%p1850_p1), [#allocation9], 4294965248  ;;  %1018 = vmatprep.subr.bf16.mxu0 %v1428_v0  ;;  %1022 = vmatprep.mubr.msk.bf16.mxu0 %vm1429_vm0, %v1428_v0  ;;  %v1180_v4 = vld [vmem:[#allocation7 + $0x8] sm:$0xff]   ;;  %v1181_v6 = vld [vmem:[#allocation7 + $0x10] sm:$0xff]   ;;  %s952_s20 = sshll.u32 %s1709_s1, 3  ;;  %s985_s13 = sshll.u32 %s1502_s15, 7 }
  0xa1   : > { %1026 = vmatprep.subr.bf16.mxu1 %v1428_v0  ;;  %1042 = vmatprep.mubr.msk.bf16.mxu1 %vm1429_vm0, %v1428_v0  ;;  %v407_v5 = vld [vmem:[%s355_s21] sm:$0xf]  ;;  %v1182_v7 = vld [vmem:[#allocation7 + $0x18] sm:$0xff]   ;;  %v1183_v8 = vld [vmem:[#allocation7 + $0x20] sm:$0xff]   ;;  %s405_s18 = scalar_lea.vmem [#allocation11], %s952_s20  ;;  %s1851_s17 = sld [smem:[#allocation17_spill]] }
  0xa2   : > { %1019 = vmatpush3.bf16.msra.mxu0 %v1177_v1  ;;  %1027 = vmatpush3.bf16.msra.mxu1 %v1179_v3  ;;  %v1184_v9 = vld [vmem:[#allocation7 + $0x28] sm:$0xff]   ;;  %v1185_v10 = vld [vmem:[#allocation7 + $0x30] sm:$0xff]   ;;  %v1186_v11 = vld [vmem:[#allocation7 + $0x38] sm:$0xff]   ;;  %s829_s26 = sshll.u32 %s405_s18, 4  ;;  %s816_s19 = scalar_lea.sflag [#allocation4], %s1709_s1  ;;  %s1778_s26 = int_to_ptr.vmem [resolvable:$true] %s829_s26 }
  0xa3   : > { %1020 = vmatprep.subr.bf16.mxu0 %v1428_v0  ;;  %1028 = vmatprep.subr.bf16.mxu1 %v1428_v0  ;;  %v1187_v12 = vld [vmem:[#allocation8] sm:$0xff]   ;;  %v1188_v13 = vld [vmem:[#allocation8 + $0x8] sm:$0xff]   ;;  %v1189_v14 = vld [vmem:[#allocation8 + $0x10] sm:$0xff]   ;;  %s1345_s15 = scalar_lea.vmem %s1778_s26, 128  ;;  %p1852_p5 = scmp.ne.s32.totalorder %s1843_s23, 0 }
  0xa4   : > { %v1190_v15 = vld [vmem:[#allocation8 + $0x18] sm:$0xff]   ;;  %v1191_v16 = vld [vmem:[#allocation8 + $0x20] sm:$0xff]   ;;  %v1192_v17 = vld [vmem:[#allocation8 + $0x28] sm:$0xff]   ;;  %p1346_p6 = scmp.ne.s32.totalorder %s1778_s26, %s1345_s15  ;;  %s1430_s22 = smov [#allocation11]  }
  0xa5   : > { %v953_v18 = vld [vmem:[%s1822_s2] ss:$0 sm:$0xff]  ;;  %v1193_v26 = vld [vmem:[#allocation8 + $0x30] sm:$0xff]   ;;  %v1194_v27 = vld [vmem:[#allocation8 + $0x38] sm:$0xff]   ;;  %s1349_s24 = sshll.u32 %s1430_s22, 4  ;;  %s1350_s24 = int_to_ptr.vmem [resolvable:$false] %s1349_s24 }
  0xa6   : > { %1021 = vmatpush3.bf16.msra.mxu0 %v1178_v2  ;;  %1029 = vmatpush3.bf16.msra.mxu1 %v1180_v4  ;;  %v1195_v28 = vld [vmem:[#allocation10] sm:$0xff]   ;;  %v1196_v29 = vld [vmem:[#allocation10 + $0x8] sm:$0xff]   ;;  %v1197_v30 = vld [vmem:[#allocation10 + $0x10] sm:$0xff]   ;;  %p1347_p7 = pnand %p1346_p6, %p1852_p5  ;;  %s1351_s20 = scalar_lea.vmem %s1350_s24, 256 }
  0xa7   : > { %1046 = vmatprep.subr.bf16.mxu0 %v1428_v0  ;;  %1030 = vmatprep.subr.bf16.mxu1 %v1428_v0  ;;  %v1198_v31 = vld [vmem:[#allocation10 + $0x18] sm:$0xff]   ;;  %v1199_v32 = vld [vmem:[#allocation10 + $0x20] sm:$0xff]   ;;  %v1200_v33 = vld [vmem:[#allocation10 + $0x28] sm:$0xff]   ;;  %s1776_s14 = scalar_lea.hbm %s1851_s17, %s985_s13  ;;  %p1352_p12 = scmp.lt.s32.totalorder %s1778_s26, %s1350_s24 }
  0xa8   : > { %v957_v34 = vld [vmem:[%s1824_s4] ss:$0 sm:$0xff]  ;;  %v1201_v42 = vld [vmem:[#allocation10 + $0x30] sm:$0xff]   ;;  %v1202_v43 = vld [vmem:[#allocation10 + $0x38] sm:$0xff]   ;;  %p1348_p9 = pneg %p1347_p7  ;;  %p1353_p3 = scmp.lt.s32.totalorder %s1351_s20, %s1345_s15 }
  0xa9   : > { %1023 = vmatmul.mubr.msk.bf16.vlgmr.msra.gmra.mrb[0].mxu0 %vm431_vm1, %v407_v5  ;;  %v966_v44 = vld [vmem:[%s1826_s6] ss:$0 sm:$0xff] }
  0xaa   : > { %1062 = vmatprep.mubr.msk.bf16.mxu0 %vm1429_vm0, %v1428_v0  ;;  %1031 = vmatpush3.bf16.msra.mxu1 %v1181_v6  ;;  %v975_v52 = vld [vmem:[%s1828_s8] ss:$0 sm:$0xff]  ;;  %p1354_p13 = por %p1353_p3, %p1352_p12 }
  0xab   : > { %1032 = vmatprep.subr.bf16.mxu1 %v1428_v0  ;;  %1047 = vmatpush3.bf16.msra.mxu0 %v1187_v12 }
  0xac   : > { %1048 = vmatprep.subr.bf16.mxu0 %v1428_v0  ;;  %p1355_p0 = pnand %p1354_p13, %p1348_p9 }
  0xae   : > { %1033 = vmatpush3.bf16.msra.mxu1 %v1182_v7 }
  0xaf   : > { %1034 = vmatprep.subr.bf16.mxu1 %v1428_v0  ;;  %1049 = vmatpush3.bf16.msra.mxu0 %v1188_v13 }
  0xb0   : > { %1050 = vmatprep.subr.bf16.mxu0 %v1428_v0 }
  0xb2   : > { %1035 = vmatpush3.bf16.msra.mxu1 %v1183_v8 }
  0xb3   : > { %1036 = vmatprep.subr.bf16.mxu1 %v1428_v0  ;;  %1051 = vmatpush3.bf16.msra.mxu0 %v1189_v14 }
  0xb4   : > { %1052 = vmatprep.subr.bf16.mxu0 %v1428_v0 }
  0xb6   : > { %1037 = vmatpush3.bf16.msra.mxu1 %v1184_v9 }
  0xb7   : > { %1038 = vmatprep.subr.bf16.mxu1 %v1428_v0  ;;  %1053 = vmatpush3.bf16.msra.mxu0 %v1190_v15 }
  0xb8   : > { %1054 = vmatprep.subr.bf16.mxu0 %v1428_v0 }
  0xba   : > { %1039 = vmatpush3.bf16.msra.mxu1 %v1185_v10 }
  0xbb   : > { %1040 = vmatprep.subr.bf16.mxu1 %v1428_v0  ;;  %1055 = vmatpush3.bf16.msra.mxu0 %v1191_v16 }
  0xbc   : > { %1056 = vmatprep.subr.bf16.mxu0 %v1428_v0 }
  0xbe   : > { %1041 = vmatpush3.bf16.msra.mxu1 %v1186_v11 }
  0xbf   : > { %1066 = vmatprep.subr.bf16.mxu1 %v1428_v0  ;;  %1057 = vmatpush3.bf16.msra.mxu0 %v1192_v17 }
  0xc0   : > { %1058 = vmatprep.subr.bf16.mxu0 %v1428_v0 }
  0xc3   : > { %1059 = vmatpush3.bf16.msra.mxu0 %v1193_v26 }
  0xc4   : > { %1060 = vmatprep.subr.bf16.mxu0 %v1428_v0 }
  0xc7   : > { %1061 = vmatpush3.bf16.msra.mxu0 %v1194_v27 }
 0x17c   : > { %v469_v19 = vpop.f32.mrb[0].mxu0 }
 0x17d   : > { %v470_v20 = vadd.f32 %v953_v18, %v469_v19  ;;  %v1024_v21 = vpop.f32.mrb[1].mxu0 }
 0x17e   : > { %v472_v22 = vpop.f32.mrb[2].mxu0 }
 0x17f   : > { %v475_v23 = vmax.f32 %v470_v20, 0.0  ;;  %v1025_v24 = vpop.f32.mrb[3].mxu0 }
 0x181   : > { %v476_v25 = vpack.c.bf16 %v475_v23, %v475_v23 }
 0x183   : > { %1043 = vmatmul.mubr.bf16.vlgmr.msra.gmra.mrb[0].mxu1 %v476_v25 }
 0x184   : > { %1082 = vmatprep.mubr.msk.bf16.mxu1 %vm1429_vm0, %v1428_v0  ;;  %1067 = vmatpush3.bf16.msra.mxu1 %v1195_v28 }
 0x185   : > { %1068 = vmatprep.subr.bf16.mxu1 %v1428_v0 }
 0x188   : > { %1069 = vmatpush3.bf16.msra.mxu1 %v1196_v29 }
 0x189   : > { %1070 = vmatprep.subr.bf16.mxu1 %v1428_v0 }
 0x18c   : > { %1071 = vmatpush3.bf16.msra.mxu1 %v1197_v30 }
 0x18d   : > { %1072 = vmatprep.subr.bf16.mxu1 %v1428_v0 }
 0x190   : > { %1073 = vmatpush3.bf16.msra.mxu1 %v1198_v31 }
 0x191   : > { %1074 = vmatprep.subr.bf16.mxu1 %v1428_v0 }
 0x194   : > { %1075 = vmatpush3.bf16.msra.mxu1 %v1199_v32 }
 0x195   : > { %1076 = vmatprep.subr.bf16.mxu1 %v1428_v0 }
 0x198   : > { %1077 = vmatpush3.bf16.msra.mxu1 %v1200_v33 }
 0x199   : > { %1078 = vmatprep.subr.bf16.mxu1 %v1428_v0 }
 0x19c   : > { %1079 = vmatpush3.bf16.msra.mxu1 %v1201_v42 }
 0x19d   : > { %1080 = vmatprep.subr.bf16.mxu1 %v1428_v0 }
 0x1a0   : > { %1081 = vmatpush3.bf16.msra.mxu1 %v1202_v43 }
 0x256   : > { %v582_v35 = vpop.f32.mrb[0].mxu1 }
 0x257   : > { %v583_v36 = vadd.f32 %v957_v34, %v582_v35  ;;  %v1044_v37 = vpop.f32.mrb[1].mxu1 }
 0x258   : > { %v585_v38 = vpop.f32.mrb[2].mxu1 }
 0x259   : > { %v588_v39 = vmax.f32 %v583_v36, 0.0  ;;  %v1045_v40 = vpop.f32.mrb[3].mxu1 }
 0x25b   : > { %v589_v41 = vpack.c.bf16 %v588_v39, %v588_v39 }
 0x25d   : > { %1063 = vmatmul.mubr.bf16.vlgmr.msra.gmra.mrb[4].mxu0 %v589_v41 }
 0x330   : > { %v695_v45 = vpop.f32.mrb[4].mxu0 }
 0x331   : > { %v696_v46 = vadd.f32 %v966_v44, %v695_v45  ;;  %v1064_v47 = vpop.f32.mrb[5].mxu0 }
 0x332   : > { %v698_v48 = vpop.f32.mrb[6].mxu0 }
 0x333   : > { %v701_v49 = vmax.f32 %v696_v46, 0.0  ;;  %v1065_v50 = vpop.f32.mrb[7].mxu0 }
 0x335   : > { %v702_v51 = vpack.c.bf16 %v701_v49, %v701_v49 }
 0x337   : > { %1083 = vmatmul.mubr.bf16.vlgmr.msra.gmra.mrb[4].mxu1 %v702_v51 }
 0x40a   : > { %v808_v53 = vpop.f32.mrb[4].mxu1 }
 0x40b   : > { %v809_v54 = vadd.f32 %v975_v52, %v808_v53  ;;  %v1084_v55 = vpop.f32.mrb[5].mxu1 }
 0x40c   : > { %v811_v56 = vpop.f32.mrb[6].mxu1 }
 0x40d   : > { %814 = vst [vmem:[%s405_s18] sm:$0xff] %v809_v54  ;;  %v1085_v57 = vpop.f32.mrb[7].mxu1 }
 0x40e   : > { %1358 = shalt.err (!%p1355_p0)
}
 0x40f   : > { %s1359_s1 = scalar_lea.hbm %s1776_s14, 128  ;;  %s1363_s13 = scalar_lea.hbm %s1851_s17, 256 }
 0x410   : > { %p1360_p2 = scmp.ne.s32.totalorder %s1776_s14, %s1359_s1  ;;  %p1364_p10 = scmp.lt.u32.totalorder %s1776_s14, %s1851_s17 }
 0x411   : > { %p1365_p11 = scmp.lt.u32.totalorder %s1363_s13, %s1359_s1  ;;  %p1367_p6 = scmp.lt.u32.totalorder %s1359_s1, %s1776_s14 }
 0x412   : > { %p1361_p8 = pnand %p1360_p2, %p1852_p5 }
 0x413   : > { %p1366_p1 = por %p1365_p11, %p1364_p10 }
 0x414   : > { %p1362_p4 = pneg %p1361_p8 }
 0x415   : > { %p1368_p7 = por %p1367_p6, %p1366_p1 }
 0x417   : > { %p1369_p9 = pnand %p1368_p7, %p1362_p4 }
 0x419   : > { %1372 = shalt.err (!%p1369_p9)
}
 0x41a   : > { %1104 = dma.vmem_to_hbm [thread:$0]  (%p1852_p5), %s1778_s26, 128, %s1776_s14, %s816_s19  }
 0x41b PF: > { %s841_s16 = sand.u32 1, %s1407_s30   ;;  %p1853_p12 = scmp.ne.s32.totalorder %s1844_s28, 0 }
 0x41c   : > { %p1854_p3 = scmp.ge.s32.totalorder %s1419_s12, 2  ;;  %s842_s15 = scalar_lea.sflag [#allocation4], %s841_s16 }
 0x41e   : > { %p1124_p13 = pnand %p1854_p3, %p1853_p12 }
 0x420   : > { %1402 = dma.done.wait (!%p1124_p13), %s842_s15, 128  }
 0x421   : > { %1404 = vsyncadd (!%p1124_p13), %s842_s15, 4294967168  ;;  %p24_p0 = scmp.ge.s32.totalorder %s1633_s27, 4   ;;  %s1855_s30 = smov %s1411_s10 }
 0x422   : > { %s1856_s10 = smov %s1415_s11  ;;  %s1857_s11 = smov %s1644_s25 }
 0x423   : > { %s1858_s12 = smov %s1633_s27  ;;  %26 = sbr.rel (!%p24_p0) target bundleno = 10 (0xa), region = 117 }
 0x42a   :  { %847 = vsyncpa [#allocation3], 1 }
 0x42b   :  { %849 = vsyncpa [#allocation3 + $0x1], 1 }
 0x42c   :  { %850 = vsyncpa [#allocation6], 1 }
 0x42d   :  { %851 = vsyncpa [#allocation9], 1 }
 0x42e   :  { %852 = vsyncpa [#allocation4], 1 }
 0x42f   :  { %854 = vsyncpa [#allocation4 + $0x1], 1 }

</bundles_post_ra>
